<compile_context>
chip_gen: v7x
topology: tpu7x:2x2x1
jax: 0.10.0
libtpu: 0.0.40
codegen_flags: <defaults>
</compile_context>

<pallas_src>
import math
import functools

import jax
import jax.numpy as jnp
from jax.experimental import pallas as pl
from jax.experimental.pallas import tpu as pltpu

_D_IN = 512
_D_HID = 64
_LANE = 128
_SUBLANE = 8


# ----------------------------------------------------------------------------
# Fused kernel: Linear(512->64, bf16 MXU) -> sigmoid (f32) -> Linear(64->Npad)
# ----------------------------------------------------------------------------
def _classifier_kernel(x_ref, w1_ref, w2_ref, bias_ref, o_ref):
    # x:    (Bp, 512)  activation dtype (f32 or bf16)
    # w1:   (512, 64)  bf16
    # w2:   (64, Npad) bf16  (columns zero-padded to a multiple of 128)
    # bias: (2, Npad)  f32   (row 0 = b1 zero-padded, row 1 = b2 zero-padded)
    # First linear: native bf16 MXU matmul, f32 accumulation. The (Bp, 64)
    # intermediate never leaves VMEM.
    h = jnp.dot(x_ref[...].astype(w1_ref.dtype), w1_ref[...],
                preferred_element_type=jnp.float32)
    h = h + bias_ref[0:1, 0:_D_HID]                  # f32 bias add (VPU)
    # Sigmoid: exp rides the EUP slot.  approx=True would also put the
    # reciprocal on the EUP (vrcp) but is kept exact so verification stays
    # tight; negligible either way at this size.
    h = pl.reciprocal(1.0 + jnp.exp(-h), approx=False)
    # Second linear: keep the sigmoid output in f32 (K=64, compute is trivial;
    # only w2's HBM bytes matter and those are already bf16).  Output columns
    # are padded to 128 lanes -> dense, unmasked store.
    out = jnp.dot(h, w2_ref[...].astype(jnp.float32),
                  preferred_element_type=jnp.float32)
    o_ref[...] = (out + bias_ref[1:2, :]).astype(o_ref.dtype)


def _fused_classifier(x, w1, w2, bias):
    """x: (Bp, 512), w1: (512, 64) bf16, w2: (64, Npad) bf16, bias: (2, Npad) f32."""
    Bp = x.shape[0]
    Np = w2.shape[1]
    # Grid-less call: every operand is a whole-array VMEM block, one
    # invocation, no pipeline/double-buffer machinery.
    return pl.pallas_call(
        _classifier_kernel,
        out_shape=jax.ShapeDtypeStruct((Bp, Np), jnp.float32),
        in_specs=[pl.BlockSpec(memory_space=pltpu.MemorySpace.VMEM)
                  for _ in range(4)],
        out_specs=pl.BlockSpec(memory_space=pltpu.MemorySpace.VMEM),
    )(x, w1, w2, bias)


# ----------------------------------------------------------------------------
# Parameter init (PyTorch nn.Linear default: U(-1/sqrt(fan_in), 1/sqrt(fan_in)))
# ----------------------------------------------------------------------------
def init_params(key, num_classes, d_in=_D_IN, d_hidden=_D_HID):
    k1, k2, k3, k4 = jax.random.split(key, 4)
    bnd1 = 1.0 / math.sqrt(d_in)
    w1 = jax.random.uniform(k1, (d_in, d_hidden), jnp.float32, -bnd1, bnd1)
    b1 = jax.random.uniform(k2, (1, d_hidden), jnp.float32, -bnd1, bnd1)
    bnd2 = 1.0 / math.sqrt(d_hidden)
    w2 = jax.random.uniform(k3, (d_hidden, num_classes), jnp.float32, -bnd2, bnd2)
    b2 = jax.random.uniform(k4, (1, num_classes), jnp.float32, -bnd2, bnd2)
    return {'w1': w1, 'b1': b1, 'w2': w2, 'b2': b2}


def prepare_params_for_tpu(params):
    """bf16 weights; final projection zero-padded to a multiple of 128 output
    lanes; both biases packed into one (2, Npad) f32 tensor (single DMA)."""
    C = params['w2'].shape[1]
    n_pad = ((C + _LANE - 1) // _LANE) * _LANE
    w1 = params['w1'].astype(jnp.bfloat16)                                 # (512, 64)
    w2 = (jnp.zeros((_D_HID, n_pad), jnp.float32)
          .at[:, :C].set(params['w2'])).astype(jnp.bfloat16)               # (64, Npad)
    bias = jnp.zeros((2, n_pad), jnp.float32)
    bias = bias.at[0, :_D_HID].set(params['b1'].reshape(-1))
    bias = bias.at[1, :C].set(params['b2'].reshape(-1))
    return {'w1': w1, 'w2': w2, 'bias': bias}


# ----------------------------------------------------------------------------
# Forward (returns the padded (Bp, 128) slab; consumer indexes [:B, :C])
# ----------------------------------------------------------------------------
@jax.jit
def target_classifier_forward(prepared, emb):
    B = emb.shape[0]
    x = emb.reshape(B, -1)                     # keep native dtype; no convert HLO
    Bp = ((B + _SUBLANE - 1) // _SUBLANE) * _SUBLANE
    if Bp != B:
        x = jnp.pad(x, ((0, Bp - B), (0, 0)))  # full-sublane MXU operand / store
    return _fused_classifier(x, prepared['w1'], prepared['w2'], prepared['bias'])


# ----------------------------------------------------------------------------
# Pure-JAX references
# ----------------------------------------------------------------------------
def _sigmoid(x):
    return 1.0 / (1.0 + jnp.exp(-x))


def reference_f32(params, emb):
    """Mirrors the PyTorch module exactly (full f32 weights)."""
    x = emb.reshape(emb.shape[0], -1).astype(jnp.float32)
    h = _sigmoid(x @ params['w1'] + params['b1'])
    return h @ params['w2'] + params['b2']


def reference_bf16_weights(params, emb):
    """Same math as the kernel: bf16-rounded weights / bf16-rounded LHS for the
    first matmul, f32 accumulation and f32 epilogue."""
    hi = jax.lax.Precision.HIGHEST
    x = emb.reshape(emb.shape[0], -1)
    w1 = params['w1'].astype(jnp.bfloat16).astype(jnp.float32)
    w2 = params['w2'].astype(jnp.bfloat16).astype(jnp.float32)
    xb = x.astype(jnp.bfloat16).astype(jnp.float32)
    h = _sigmoid(jnp.dot(xb, w1, precision=hi) + params['b1'])
    return jnp.dot(h, w2, precision=hi) + params['b2']


# ----------------------------------------------------------------------------
if __name__ == "__main__":
    num_classes = 2                      # configs.num_classes_target
    batch = 2

    key = jax.random.PRNGKey(0)
    kp, kx = jax.random.split(key)
    params = init_params(kp, num_classes)
    prepared = prepare_params_for_tpu(params)

    # emb flattens to 512 features, matching nn.Linear(512, 64).
    emb = jax.random.normal(kx, (batch, 2, 256), jnp.float32)

    padded_out = target_classifier_forward(prepared, emb)
    padded_out = jax.block_until_ready(padded_out)
    assert padded_out.shape == (8, 128)

    # Consumer-side indexing of the padded slab (padded columns are exact 0).
    pred = padded_out[:batch, :num_classes]
    assert pred.shape == (batch, num_classes)
    assert bool(jnp.all(padded_out[:batch, num_classes:] == 0.0))

    ref_same_math = reference_bf16_weights(params, emb)
    ref_full_f32 = reference_f32(params, emb)
    err_same = float(jnp.max(jnp.abs(pred - ref_same_math)))
    err_f32 = float(jnp.max(jnp.abs(pred - ref_full_f32)))
    assert err_same < 1e-4, f"kernel vs bf16-weight reference: max abs diff {err_same}"
    assert err_f32 < 5e-2, f"kernel vs f32 reference (bf16 rounding drift): {err_f32}"
    print("KERNEL_OK")
</pallas_src>

<mosaic_0001>
module attributes {stable_mosaic.version = 11 : i64} {
  func.func @_classifier_kernel(%arg0: memref<8x512xf32, #tpu.memory_space<vmem>>, %arg1: memref<512x64xbf16, #tpu.memory_space<vmem>>, %arg2: memref<64x128xbf16, #tpu.memory_space<vmem>>, %arg3: memref<2x128xf32, #tpu.memory_space<vmem>>, %arg4: memref<8x128xf32, #tpu.memory_space<vmem>>) attributes {dimension_semantics = [], scalar_prefetch = 0 : i64, scratch_operands = 0 : i64, tpu.core_type = #tpu.core_type<tc>} {
    %c0 = arith.constant 0 : index
    %c0_0 = arith.constant 0 : index
    %0 = vector.load %arg0[%c0, %c0_0] : memref<8x512xf32, #tpu.memory_space<vmem>>, vector<8x512xf32>
    %1 = arith.truncf %0 : vector<8x512xf32> to vector<8x512xbf16>
    %c0_1 = arith.constant 0 : index
    %c0_2 = arith.constant 0 : index
    %2 = vector.load %arg1[%c0_1, %c0_2] : memref<512x64xbf16, #tpu.memory_space<vmem>>, vector<512x64xbf16>
    %cst = arith.constant dense<0.000000e+00> : vector<8x64xf32>
    %3 = tpu.matmul %1, %2, %cst {dimension_numbers = #tpu.dot_dimension_numbers<[1], [0], [0], [1], [0, 0, 1, 1], [], []>} : vector<8x512xbf16>, vector<512x64xbf16>, vector<8x64xf32> -> vector<8x64xf32>
    %c0_3 = arith.constant 0 : index
    %c0_4 = arith.constant 0 : index
    %4 = vector.load %arg3[%c0_3, %c0_4] : memref<2x128xf32, #tpu.memory_space<vmem>>, vector<1x64xf32>
    %5 = vector.broadcast %4 : vector<1x64xf32> to vector<8x64xf32>
    %6 = arith.addf %3, %5 : vector<8x64xf32>
    %cst_5 = arith.constant 0.000000e+00 : f32
    %7 = vector.broadcast %cst_5 : f32 to vector<8x64xf32>
    %8 = arith.subf %7, %6 : vector<8x64xf32>
    %9 = math.exp %8 : vector<8x64xf32>
    %cst_6 = arith.constant 1.000000e+00 : f32
    %10 = vector.broadcast %cst_6 : f32 to vector<8x64xf32>
    %11 = arith.addf %10, %9 : vector<8x64xf32>
    %12 = tpu.reciprocal %11 : vector<8x64xf32> -> vector<8x64xf32>
    %c0_7 = arith.constant 0 : index
    %c0_8 = arith.constant 0 : index
    %13 = vector.load %arg2[%c0_7, %c0_8] : memref<64x128xbf16, #tpu.memory_space<vmem>>, vector<64x128xbf16>
    %14 = arith.extf %13 : vector<64x128xbf16> to vector<64x128xf32>
    %cst_9 = arith.constant dense<0.000000e+00> : vector<8x128xf32>
    %15 = tpu.matmul %12, %14, %cst_9 {dimension_numbers = #tpu.dot_dimension_numbers<[1], [0], [0], [1], [0, 0, 1, 1], [], []>} : vector<8x64xf32>, vector<64x128xf32>, vector<8x128xf32> -> vector<8x128xf32>
    %c1 = arith.constant 1 : index
    %c0_10 = arith.constant 0 : index
    %16 = vector.load %arg3[%c1, %c0_10] : memref<2x128xf32, #tpu.memory_space<vmem>>, vector<1x128xf32>
    %17 = vector.broadcast %16 : vector<1x128xf32> to vector<8x128xf32>
    %18 = arith.addf %15, %17 : vector<8x128xf32>
    %c0_11 = arith.constant 0 : index
    %c0_12 = arith.constant 0 : index
    %19 = vector.load %arg4[%c0_11, %c0_12] : memref<8x128xf32, #tpu.memory_space<vmem>>, vector<8x128xf32>
    tpu.vector_store %arg4[%c0_11, %c0_12], %18 {strides = array<i32>} : memref<8x128xf32, #tpu.memory_space<vmem>>, vector<8x128xf32>,
    return
  }
}

</mosaic_0001>

<bundles_post_ra>
// kernel: target_classifier_forward.1
= control target key start
LH: loop header
LB: loop body
LE: loop exit
PB: predicated region body
PF: predicated region fallthrough
CT: control target
= control target key end

     0   :  { %s852_s0 = inlined_call_operand.vmem [shape: f32[8,512], index: 0, kind: input, shape index: {}]   ;;  %s853_s1 = inlined_call_operand.vmem [shape: bf16[512,64], index: 1, kind: input, shape index: {}]   ;;  %s854_s2 = inlined_call_operand.vmem [shape: bf16[64,128], index: 2, kind: input, shape index: {}]   ;;  %s855_s3 = inlined_call_operand.vmem [shape: f32[2,128], index: 3, kind: input, shape index: {}]   ;;  %s856_s4 = inlined_call_operand.hbm [shape: f32[8,128], index: 4, kind: output, shape index: {}]  }
   0x1   :  { %v625_v0 = vld [vmem:[%s853_s1 + $0x40] sm:$0xff]   ;;  %v629_v4 = vld [vmem:[%s853_s1 + $0x48] sm:$0xff]   ;;  %v633_v8 = vld [vmem:[%s853_s1 + $0x50] sm:$0xff]  }
   0x2   :  { %v626_v1 = vld [vmem:[%s853_s1 + $0xc0] sm:$0xff]   ;;  %537 = vmatprep.subr.bf16.mxu0 %v625_v0  ;;  %v630_v5 = vld [vmem:[%s853_s1 + $0xc8] sm:$0xff]   ;;  %v634_v9 = vld [vmem:[%s853_s1 + $0xd0] sm:$0xff]  }
   0x3   :  { %v627_v2 = vld [vmem:[%s853_s1] sm:$0xff]   ;;  %559 = vmatprep.subr.bf16.mxu1 %v626_v1  ;;  %v631_v6 = vld [vmem:[%s853_s1 + $0x8] sm:$0xff]   ;;  %v635_v10 = vld [vmem:[%s853_s1 + $0x10] sm:$0xff]  }
   0x4   :  { %v628_v3 = vld [vmem:[%s853_s1 + $0x80] sm:$0xff]   ;;  %538 = vmatpush3.bf16.msra.mxu0 %v627_v2  ;;  %v632_v7 = vld [vmem:[%s853_s1 + $0x88] sm:$0xff]   ;;  %v636_v11 = vld [vmem:[%s853_s1 + $0x90] sm:$0xff]  }
   0x5   :  { %560 = vmatpush3.bf16.msra.mxu1 %v628_v3  ;;  %539 = vmatprep.subr.bf16.mxu0 %v629_v4  ;;  %v637_v12 = vld [vmem:[%s853_s1 + $0x58] sm:$0xff]   ;;  %v641_v16 = vld [vmem:[%s853_s1 + $0x60] sm:$0xff]   ;;  %v645_v20 = vld [vmem:[%s853_s1 + $0x68] sm:$0xff]  }
   0x6   :  { %561 = vmatprep.subr.bf16.mxu1 %v630_v5  ;;  %v638_v13 = vld [vmem:[%s853_s1 + $0xd8] sm:$0xff]   ;;  %v642_v17 = vld [vmem:[%s853_s1 + $0xe0] sm:$0xff]   ;;  %v646_v21 = vld [vmem:[%s853_s1 + $0xe8] sm:$0xff]  }
   0x7   :  { %v639_v14 = vld [vmem:[%s853_s1 + $0x18] sm:$0xff]   ;;  %v643_v18 = vld [vmem:[%s853_s1 + $0x20] sm:$0xff]   ;;  %v647_v22 = vld [vmem:[%s853_s1 + $0x28] sm:$0xff]  }
   0x8   :  { %540 = vmatpush3.bf16.msra.mxu0 %v631_v6  ;;  %v640_v15 = vld [vmem:[%s853_s1 + $0x98] sm:$0xff]   ;;  %v644_v19 = vld [vmem:[%s853_s1 + $0xa0] sm:$0xff]   ;;  %v648_v23 = vld [vmem:[%s853_s1 + $0xa8] sm:$0xff]  }
   0x9   :  { %562 = vmatpush3.bf16.msra.mxu1 %v632_v7  ;;  %541 = vmatprep.subr.bf16.mxu0 %v633_v8  ;;  %v649_v24 = vld [vmem:[%s853_s1 + $0x70] sm:$0xff]   ;;  %v653_v28 = vld [vmem:[%s853_s1 + $0x78] sm:$0xff]   ;;  %v20_v32 = vld [vmem:[%s852_s0 + $0x8] sm:$0xff] }
   0xa   :  { %563 = vmatprep.subr.bf16.mxu1 %v634_v9  ;;  %v650_v25 = vld [vmem:[%s853_s1 + $0xf0] sm:$0xff]   ;;  %v654_v29 = vld [vmem:[%s853_s1 + $0xf8] sm:$0xff]   ;;  %v19_v34 = vld [vmem:[%s852_s0] sm:$0xff]  ;;  %v24_v35 = vpack.c.bf16 %v20_v32, %v20_v32 }
   0xb   :  { %v651_v26 = vld [vmem:[%s853_s1 + $0x30] sm:$0xff]   ;;  %v655_v30 = vld [vmem:[%s853_s1 + $0x38] sm:$0xff]   ;;  %v23_v37 = vpack.c.bf16 %v19_v34, %v19_v34 }
   0xc   :  { %542 = vmatpush3.bf16.msra.mxu0 %v635_v10  ;;  %v652_v27 = vld [vmem:[%s853_s1 + $0xb0] sm:$0xff]   ;;  %v656_v31 = vld [vmem:[%s853_s1 + $0xb8] sm:$0xff]  }
   0xd   :  { %564 = vmatpush3.bf16.msra.mxu1 %v636_v11  ;;  %543 = vmatprep.subr.bf16.mxu0 %v637_v12  ;;  %v22_v33 = vld [vmem:[%s852_s0 + $0x18] sm:$0xff]  ;;  %v21_v38 = vld [vmem:[%s852_s0 + $0x10] sm:$0xff] }
   0xe   :  { %565 = vmatprep.subr.bf16.mxu1 %v638_v13  ;;  %v26_v36 = vpack.c.bf16 %v22_v33, %v22_v33 }
  0x10   :  { %544 = vmatpush3.bf16.msra.mxu0 %v639_v14 }
  0x11   :  { %566 = vmatpush3.bf16.msra.mxu1 %v640_v15  ;;  %545 = vmatprep.subr.bf16.mxu0 %v641_v16 }
  0x12   :  { %567 = vmatprep.subr.bf16.mxu1 %v642_v17 }
  0x14   :  { %546 = vmatpush3.bf16.msra.mxu0 %v643_v18 }
  0x15   :  { %568 = vmatpush3.bf16.msra.mxu1 %v644_v19  ;;  %547 = vmatprep.subr.bf16.mxu0 %v645_v20 }
  0x16   :  { %569 = vmatprep.subr.bf16.mxu1 %v646_v21 }
  0x18   :  { %548 = vmatpush3.bf16.msra.mxu0 %v647_v22 }
  0x19   :  { %570 = vmatpush3.bf16.msra.mxu1 %v648_v23  ;;  %549 = vmatprep.subr.bf16.mxu0 %v649_v24 }
  0x1a   :  { %571 = vmatprep.subr.bf16.mxu1 %v650_v25 }
  0x1c   :  { %550 = vmatpush3.bf16.msra.mxu0 %v651_v26 }
  0x1d   :  { %572 = vmatpush3.bf16.msra.mxu1 %v652_v27  ;;  %551 = vmatprep.subr.bf16.mxu0 %v653_v28 }
  0x1e   :  { %573 = vmatprep.subr.bf16.mxu1 %v654_v29 }
  0x20   :  { %552 = vmatpush3.bf16.msra.mxu0 %v655_v30 }
  0x21   :  { %574 = vmatpush3.bf16.msra.mxu1 %v656_v31 }
  0x22   :  { %9 = vsyncpa [#allocation3], 0  ;;  %v25_v39 = vpack.c.bf16 %v21_v38, %v21_v38  ;;  %320 = vmatprep.mubr.bf16.mxu0 %v24_v35  ;;  %360 = vmatprep.mubr.bf16.mxu1 %v26_v36  ;;  %v685_v40 = vmov 0.0|0.0   ;;  %v519_v41 = vld [vmem:[%s854_s2] sm:$0xff]   ;;  %v534_v42 = vld [vmem:[%s854_s2 + $0x8] sm:$0xff]   ;;  %vm686_vm0 = vmmov 0  }
  0x23   :  { %321 = vmatmul.mubr.bf16.vlgmr.msra.gmra.mrb[0].mxu0 %v23_v37  ;;  %609 = vmatprep.subr.bf16.mxu0 %v685_v40  ;;  %v535_v43 = vld [vmem:[%s854_s2 + $0x10] sm:$0xff]   ;;  %v687_v44 = vmov 0.0   ;;  %v536_v45 = vld [vmem:[%s854_s2 + $0x18] sm:$0xff]   ;;  %v483_v48 = vld [vmem:[%s855_s3] ss:$0 sm:$0xff]  ;;  %vm394_vm1 = vcmask 523264  }
  0x24   :  { %361 = vmatmul.mubr.bf16.vlgmr.msra.gmra.mrb[0].mxu1 %v25_v39  ;;  %611 = vmatpush3.bf16.msra.mxu0 %v519_v41  ;;  %v516_v0 = vld [vmem:[%s855_s3 + $0x1] ss:$0 sm:$0xff]  ;;  %s688_s18 = smov [#allocation2]  }
  0x25   :  { %612 = vmatprep.subr.bf16.mxu0 %v685_v40  ;;  %606 = vmatprep.mubr.msk.f32.mxu0 %vm686_vm0, %v687_v44  ;;  %s475_s19 = sshll.u32 %s688_s18, 4  ;;  %s476_s19 = int_to_ptr.vmem [resolvable:$true] %s475_s19 }
  0x26   :  { %s661_s20 = scalar_lea.vmem %s476_s19, 128  ;;  %p666_p1 = scmp.lt.s32.totalorder %s476_s19, %s476_s19 }
  0x27   :  { %p662_p0 = scmp.ne.s32.totalorder %s476_s19, %s661_s20  ;;  %p667_p2 = scmp.lt.s32.totalorder %s661_s20, %s661_s20 }
  0x28   :  { %614 = vmatpush3.bf16.msra.mxu0 %v534_v42 }
  0x29   :  { %615 = vmatprep.subr.bf16.mxu0 %v685_v40  ;;  %p668_p3 = por %p667_p2, %p666_p1 }
  0x2b   :  { %p669_p4 = pnand %p668_p3, %p662_p0 }
  0x2c   :  { %617 = vmatpush3.bf16.msra.mxu0 %v535_v43 }
  0x2d   :  { %618 = vmatprep.subr.bf16.mxu0 %v685_v40 }
  0x30   :  { %620 = vmatpush3.bf16.msra.mxu0 %v536_v45 }
  0xf6   :  { %v553_v46 = vpop.f32.mrb[0].mxu0 }
  0xf7   :  { %v575_v47 = vpop.f32.mrb[0].mxu1  ;;  %v554_v49 = vpop.f32.mrb[1].mxu0 }
  0xf8   :  { %v576_v50 = vpop.f32.mrb[1].mxu1  ;;  %v555_v51 = vadd.f32 %v554_v49, %v553_v46  ;;  %v556_v53 = vpop.f32.mrb[2].mxu0 }
  0xf9   :  { %v577_v52 = vadd.f32 %v576_v50, %v575_v47  ;;  %v578_v54 = vpop.f32.mrb[2].mxu1  ;;  %v557_v55 = vpop.f32.mrb[3].mxu0 }
  0xfa   :  { %v579_v56 = vpop.f32.mrb[3].mxu1  ;;  %v323_v57 = vadd.f32 %v555_v51, %v483_v48 }
  0xfc   :  { %v363_v58 = vadd.f32 %v577_v52, %v323_v57 }
  0xfe   :  { %v368_v59 = vsub.f32 0.0, %v363_v58 }
 0x100   :  { %v369_v60 = vmul.f32 1.442695, %v368_v59 }
 0x102   :  { %657 = vpow2.f32 %v369_v60 }
 0x10c   :  { %v658_v61 = vpop.eup %657 }
 0x10d   :  { %v371_v62 = vadd.f32 1.0, %v658_v61 }
 0x10f   :  { %659 = vrcp.f32 %v371_v62 }
 0x119   :  { %v660_v63 = vpop.eup %659 }
 0x11a   :  { %607 = vmatmul.mubr.msk.f32.vlgmr.msra.gmra.mrb[4].mxu0 %vm394_vm1, %v660_v63 }
 0x1ed   :  { %v464_v1 = vpop.f32.mrb[4].mxu0 }
 0x1ee   :  { %v465_v2 = vadd.f32 %v516_v0, %v464_v1  ;;  %v608_v3 = vpop.f32.mrb[5].mxu0 }
 0x1f0   :  { %468 = vst [vmem:[#allocation2] sm:$0xff] %v465_v2 }
 0x1f1   :  { %672 = shalt.err (!%p669_p4)
}
 0x1f2   :  { %s673_s23 = scalar_lea.hbm %s856_s4, 128 }
 0x1f3   :  { %p674_p5 = scmp.ne.s32.totalorder %s856_s4, %s673_s23  ;;  %p677_p6 = scmp.lt.u32.totalorder %s673_s23, %s856_s4 }
 0x1f5   :  { %p679_p7 = pnand %p677_p6, %p674_p5 }
 0x1f7   :  { %682 = shalt.err (!%p679_p7)
}
 0x1f8   :  { %478 = dma.vmem_to_hbm [thread:$0]  %s476_s19, 128, %s856_s4, [#allocation3]  }
 0x1f9   :  { %683 = dma.done.wait [#allocation3], 128  }
 0x1fa   :  { %684 = vsyncadd [#allocation3], 4294967168 }
 0x1fb   :  { %482 = vsyncpa [#allocation3], 1 }

</bundles_post_ra>
